<compile_context>
chip_gen: v5e
topology: v5e:2x2
jax: 0.10.0
libtpu: 0.0.40
codegen_flags: <defaults>
</compile_context>

<pallas_src>
import math

import jax
import jax.numpy as jnp
from jax.experimental import pallas as pl
from jax.experimental.pallas import tpu as pltpu


# ----------------------------------------------------------------------------
# Fused kernel: 3 packed matmuls + sample + squash + log-prob, all in VMEM.
# ----------------------------------------------------------------------------
def _fused_policy_kernel(x_ref, w1_ref, b1_ref, w2_ref, b2_ref, w3_ref, b3_ref,
                         logstd_ref, noise_ref,
                         packed_ref, action_ref):
    A = action_ref.shape[1]          # action_space (static)

    x = x_ref[...]                                                        # (B, obs)

    # Layer 1 (actor | critic fused): (B, obs) @ (obs, 128) -> (B, 128)
    h1 = jnp.dot(x, w1_ref[...], preferred_element_type=jnp.float32) + b1_ref[...]
    h1 = jnp.maximum(h1, 0.0)

    # Layer 2 (block-diagonal): (B, 128) @ (128, 256) -> (B, 256)
    h2 = jnp.dot(h1, w2_ref[...], preferred_element_type=jnp.float32) + b2_ref[...]
    h2 = jnp.maximum(h2, 0.0)

    # Layer 3 (padded heads): (B, 256) @ (256, 128) -> (B, 128)
    #   columns [0, A) = mean, column A = value, rest exactly zero.
    out3 = jnp.dot(h2, w3_ref[...], preferred_element_type=jnp.float32) + b3_ref[...]

    mean = out3[:, :A]                                                    # (B, A)
    logstd = logstd_ref[...]                                              # (1, A)
    std = jnp.exp(logstd)                                                 # EUP

    # Sample the row-0 action (matches action.data.cpu().numpy()[0] in PyTorch)
    # and squash: tanh on component 0, sigmoid on the rest (A == 3 in the module).
    raw0 = mean[0:1, :] + std * noise_ref[...]                            # (1, A)
    acol = jax.lax.broadcasted_iota(jnp.int32, (1, A), 1)
    squashed = jnp.where(acol == 0,
                         jnp.tanh(raw0),
                         1.0 / (1.0 + jnp.exp(-raw0)))                    # (1, A)
    action_ref[...] = squashed

    # Gaussian log-density of the squashed action under N(mean, std), summed over A.
    # Divide-free: -(a-mean)^2 * (0.5 * exp(-2*logstd)) + const.
    inv_two_var = 0.5 * jnp.exp(-2.0 * logstd)                            # (1, A)
    const = -0.5 * math.log(2.0 * math.pi) - logstd                       # (1, A)
    diff = squashed - mean                                                # (B, A)
    logprob = jnp.sum(-(diff * diff) * inv_two_var + const,
                      axis=-1, keepdims=True)                             # (B, 1)

    # Pack logprob into lane column A+1 of the lane-dense output slab.
    col = jax.lax.broadcasted_iota(jnp.int32, out3.shape, 1)
    packed_ref[...] = out3 + jnp.where(col == A + 1, logprob, 0.0)


# ----------------------------------------------------------------------------
# Wrapper
# ----------------------------------------------------------------------------
OUT_W = 128   # lane-dense output width


def mlp_policy_forward(x, packed, noise_key):
    """Returns (v, action, logprob, mean) matching MLPPolicy.forward semantics."""
    B = x.shape[0]
    A = packed["logstd"].shape[1]

    # torch.normal(mean, std): only row 0 of the sample is ever used downstream,
    # so a (1, A) standard-normal draw is statistically equivalent.
    noise = jax.random.normal(noise_key, (1, A), jnp.float32)

    vmem = pl.BlockSpec(memory_space=pltpu.MemorySpace.VMEM)

    packed_out, action = pl.pallas_call(
        _fused_policy_kernel,
        out_shape=(jax.ShapeDtypeStruct((B, OUT_W), jnp.float32),
                   jax.ShapeDtypeStruct((1, A), jnp.float32)),
        in_specs=[vmem] * 9,
        out_specs=(vmem, vmem),
    )(x,
      packed["w1"], packed["b1"],
      packed["w2"], packed["b2"],
      packed["w3"], packed["b3"],
      packed["logstd"], noise)

    mean = packed_out[:, :A]
    v = packed_out[:, A:A + 1]
    logprob = packed_out[:, A + 1:A + 2]
    return v, action, logprob, mean


# ----------------------------------------------------------------------------
# Parameter init (mimics PyTorch Linear default U(-k, k), k = 1/sqrt(fan_in);
# logstd initialized to zeros) and packing into the fused layout.
# ----------------------------------------------------------------------------
def init_params(key, obs_space, action_space):
    def linear(k, fan_in, fan_out):
        kw, kb = jax.random.split(k)
        bound = 1.0 / math.sqrt(fan_in)
        w = jax.random.uniform(kw, (fan_in, fan_out), jnp.float32, -bound, bound)
        b = jax.random.uniform(kb, (1, fan_out), jnp.float32, -bound, bound)
        return w, b

    keys = jax.random.split(key, 6)
    act_w1, act_b1 = linear(keys[0], obs_space, 64)
    act_w2, act_b2 = linear(keys[1], 64, 128)
    mu_w, mu_b = linear(keys[2], 128, action_space)
    val_w1, val_b1 = linear(keys[3], obs_space, 64)
    val_w2, val_b2 = linear(keys[4], 64, 128)
    val_w3, val_b3 = linear(keys[5], 128, 1)

    return {
        "act_w1": act_w1, "act_b1": act_b1,
        "act_w2": act_w2, "act_b2": act_b2,
        "mu_w": mu_w, "mu_b": mu_b,
        "val_w1": val_w1, "val_b1": val_b1,
        "val_w2": val_w2, "val_b2": val_b2,
        "val_w3": val_w3, "val_b3": val_b3,
        "logstd": jnp.zeros((1, action_space), jnp.float32),
    }


def pack_params(p):
    """Pack per-layer PyTorch-style params into the fused 3-matmul layout."""
    A = p["mu_w"].shape[1]

    # Layer 1: concat actor | critic along the output dim -> (obs, 128)
    w1 = jnp.concatenate([p["act_w1"], p["val_w1"]], axis=1)
    b1 = jnp.concatenate([p["act_b1"], p["val_b1"]], axis=1)

    # Layer 2: block-diagonal (128, 256); zeros kill actor<->critic cross terms.
    w2 = jnp.zeros((128, 256), jnp.float32)
    w2 = w2.at[:64, :128].set(p["act_w2"]).at[64:, 128:].set(p["val_w2"])
    b2 = jnp.concatenate([p["act_b2"], p["val_b2"]], axis=1)

    # Layer 3: heads padded to a lane-dense 128-wide output.
    w3 = jnp.zeros((256, OUT_W), jnp.float32)
    w3 = w3.at[:128, :A].set(p["mu_w"]).at[128:, A:A + 1].set(p["val_w3"])
    b3 = jnp.zeros((1, OUT_W), jnp.float32)
    b3 = b3.at[:, :A].set(p["mu_b"]).at[:, A:A + 1].set(p["val_b3"])

    return {"w1": w1, "b1": b1, "w2": w2, "b2": b2, "w3": w3, "b3": b3,
            "logstd": p["logstd"]}


# ----------------------------------------------------------------------------
# Pure-JAX reference (for a correctness sanity check against the fused kernel).
# ----------------------------------------------------------------------------
def _ref_forward(x, p, action):
    h = jnp.maximum(x @ p["act_w1"] + p["act_b1"], 0.0)
    h = jnp.maximum(h @ p["act_w2"] + p["act_b2"], 0.0)
    mean = h @ p["mu_w"] + p["mu_b"]
    g = jnp.maximum(x @ p["val_w1"] + p["val_b1"], 0.0)
    g = jnp.maximum(g @ p["val_w2"] + p["val_b2"], 0.0)
    v = g @ p["val_w3"] + p["val_b3"]
    logstd = p["logstd"]
    std = jnp.exp(logstd)
    ld = (-(action - mean) ** 2 / (2.0 * std * std)
          - 0.5 * math.log(2.0 * math.pi) - logstd)
    return v, mean, jnp.sum(ld, axis=-1, keepdims=True)


if __name__ == "__main__":
    obs_space = 16
    action_space = 3
    batch = 2

    root = jax.random.PRNGKey(0)
    k_params, k_x, k_noise = jax.random.split(root, 3)

    params = init_params(k_params, obs_space, action_space)
    packed = pack_params(params)
    x = jax.random.normal(k_x, (batch, obs_space), jnp.float32)

    v, action, logprob, mean = mlp_policy_forward(x, packed, k_noise)
    jax.block_until_ready((v, action, logprob, mean))

    assert v.shape == (batch, 1)
    assert action.shape == (1, action_space)
    assert logprob.shape == (batch, 1)
    assert mean.shape == (batch, action_space)

    # Sanity check against a pure-JAX reference (loose tol covers MXU f32 path).
    v_ref, mean_ref, logprob_ref = _ref_forward(x, params, action)
    assert jnp.allclose(v, v_ref, rtol=2e-2, atol=2e-2)
    assert jnp.allclose(mean, mean_ref, rtol=2e-2, atol=2e-2)
    assert jnp.allclose(logprob, logprob_ref, rtol=2e-2, atol=2e-2)

    print("KERNEL_OK")
</pallas_src>

<mosaic_0001>
module attributes {stable_mosaic.version = 11 : i64} {
  func.func @_fused_policy_kernel(%arg0: memref<2x16xf32, #tpu.memory_space<vmem>>, %arg1: memref<16x128xf32, #tpu.memory_space<vmem>>, %arg2: memref<1x128xf32, #tpu.memory_space<vmem>>, %arg3: memref<128x256xf32, #tpu.memory_space<vmem>>, %arg4: memref<1x256xf32, #tpu.memory_space<vmem>>, %arg5: memref<256x128xf32, #tpu.memory_space<vmem>>, %arg6: memref<1x128xf32, #tpu.memory_space<vmem>>, %arg7: memref<1x3xf32, #tpu.memory_space<vmem>>, %arg8: memref<1x3xf32, #tpu.memory_space<vmem>>, %arg9: memref<2x128xf32, #tpu.memory_space<vmem>>, %arg10: memref<1x3xf32, #tpu.memory_space<vmem>>) attributes {dimension_semantics = [], scalar_prefetch = 0 : i64, scratch_operands = 0 : i64, tpu.core_type = #tpu.core_type<tc>} {
    %c0 = arith.constant 0 : index
    %c0_0 = arith.constant 0 : index
    %0 = vector.load %arg0[%c0, %c0_0] : memref<2x16xf32, #tpu.memory_space<vmem>>, vector<2x16xf32>
    %c0_1 = arith.constant 0 : index
    %c0_2 = arith.constant 0 : index
    %1 = vector.load %arg1[%c0_1, %c0_2] : memref<16x128xf32, #tpu.memory_space<vmem>>, vector<16x128xf32>
    %cst = arith.constant dense<0.000000e+00> : vector<2x128xf32>
    %2 = tpu.matmul %0, %1, %cst {dimension_numbers = #tpu.dot_dimension_numbers<[1], [0], [0], [1], [0, 0, 1, 1], [], []>} : vector<2x16xf32>, vector<16x128xf32>, vector<2x128xf32> -> vector<2x128xf32>
    %c0_3 = arith.constant 0 : index
    %c0_4 = arith.constant 0 : index
    %3 = vector.load %arg2[%c0_3, %c0_4] : memref<1x128xf32, #tpu.memory_space<vmem>>, vector<1x128xf32>
    %4 = vector.broadcast %3 : vector<1x128xf32> to vector<2x128xf32>
    %5 = arith.addf %2, %4 : vector<2x128xf32>
    %cst_5 = arith.constant 0.000000e+00 : f32
    %6 = vector.broadcast %cst_5 : f32 to vector<2x128xf32>
    %7 = arith.maximumf %5, %6 : vector<2x128xf32>
    %c0_6 = arith.constant 0 : index
    %c0_7 = arith.constant 0 : index
    %8 = vector.load %arg3[%c0_6, %c0_7] : memref<128x256xf32, #tpu.memory_space<vmem>>, vector<128x256xf32>
    %cst_8 = arith.constant dense<0.000000e+00> : vector<2x256xf32>
    %9 = tpu.matmul %7, %8, %cst_8 {dimension_numbers = #tpu.dot_dimension_numbers<[1], [0], [0], [1], [0, 0, 1, 1], [], []>} : vector<2x128xf32>, vector<128x256xf32>, vector<2x256xf32> -> vector<2x256xf32>
    %c0_9 = arith.constant 0 : index
    %c0_10 = arith.constant 0 : index
    %10 = vector.load %arg4[%c0_9, %c0_10] : memref<1x256xf32, #tpu.memory_space<vmem>>, vector<1x256xf32>
    %11 = vector.broadcast %10 : vector<1x256xf32> to vector<2x256xf32>
    %12 = arith.addf %9, %11 : vector<2x256xf32>
    %cst_11 = arith.constant 0.000000e+00 : f32
    %13 = vector.broadcast %cst_11 : f32 to vector<2x256xf32>
    %14 = arith.maximumf %12, %13 : vector<2x256xf32>
    %c0_12 = arith.constant 0 : index
    %c0_13 = arith.constant 0 : index
    %15 = vector.load %arg5[%c0_12, %c0_13] : memref<256x128xf32, #tpu.memory_space<vmem>>, vector<256x128xf32>
    %cst_14 = arith.constant dense<0.000000e+00> : vector<2x128xf32>
    %16 = tpu.matmul %14, %15, %cst_14 {dimension_numbers = #tpu.dot_dimension_numbers<[1], [0], [0], [1], [0, 0, 1, 1], [], []>} : vector<2x256xf32>, vector<256x128xf32>, vector<2x128xf32> -> vector<2x128xf32>
    %c0_15 = arith.constant 0 : index
    %c0_16 = arith.constant 0 : index
    %17 = vector.load %arg6[%c0_15, %c0_16] : memref<1x128xf32, #tpu.memory_space<vmem>>, vector<1x128xf32>
    %18 = vector.broadcast %17 : vector<1x128xf32> to vector<2x128xf32>
    %19 = arith.addf %16, %18 : vector<2x128xf32>
    %20 = vector.extract_strided_slice %19 {offsets = [0, 0], sizes = [2, 3], strides = [1, 1]} : vector<2x128xf32> to vector<2x3xf32>
    %c0_17 = arith.constant 0 : index
    %c0_18 = arith.constant 0 : index
    %21 = vector.load %arg7[%c0_17, %c0_18] : memref<1x3xf32, #tpu.memory_space<vmem>>, vector<1x3xf32>
    %22 = math.exp %21 : vector<1x3xf32>
    %23 = vector.extract_strided_slice %20 {offsets = [0, 0], sizes = [1, 3], strides = [1, 1]} : vector<2x3xf32> to vector<1x3xf32>
    %c0_19 = arith.constant 0 : index
    %c0_20 = arith.constant 0 : index
    %24 = vector.load %arg8[%c0_19, %c0_20] : memref<1x3xf32, #tpu.memory_space<vmem>>, vector<1x3xf32>
    %25 = arith.mulf %22, %24 : vector<1x3xf32>
    %26 = arith.addf %23, %25 : vector<1x3xf32>
    %27 = tpu.iota {dimensions = array<i32: 1>} : vector<1x3xi32>
    %c0_i32 = arith.constant 0 : i32
    %28 = vector.broadcast %c0_i32 : i32 to vector<1x3xi32>
    %29 = arith.cmpi eq, %27, %28 : vector<1x3xi32>
    %30 = math.tanh %26 : vector<1x3xf32>
    %cst_21 = arith.constant 0.000000e+00 : f32
    %31 = vector.broadcast %cst_21 : f32 to vector<1x3xf32>
    %32 = arith.subf %31, %26 : vector<1x3xf32>
    %33 = math.exp %32 : vector<1x3xf32>
    %cst_22 = arith.constant 1.000000e+00 : f32
    %34 = vector.broadcast %cst_22 : f32 to vector<1x3xf32>
    %35 = arith.addf %34, %33 : vector<1x3xf32>
    %cst_23 = arith.constant 1.000000e+00 : f32
    %36 = vector.broadcast %cst_23 : f32 to vector<1x3xf32>
    %37 = arith.divf %36, %35 : vector<1x3xf32>
    %38 = arith.select %29, %30, %37 : vector<1x3xi1>, vector<1x3xf32>
    %c0_24 = arith.constant 0 : index
    %c0_25 = arith.constant 0 : index
    %39 = vector.load %arg10[%c0_24, %c0_25] : memref<1x3xf32, #tpu.memory_space<vmem>>, vector<1x3xf32>
    tpu.vector_store %arg10[%c0_24, %c0_25], %38 {strides = array<i32>} : memref<1x3xf32, #tpu.memory_space<vmem>>, vector<1x3xf32>,
    %cst_26 = arith.constant -2.000000e+00 : f32
    %40 = vector.broadcast %cst_26 : f32 to vector<1x3xf32>
    %41 = arith.mulf %40, %21 : vector<1x3xf32>
    %42 = math.exp %41 : vector<1x3xf32>
    %cst_27 = arith.constant 5.000000e-01 : f32
    %43 = vector.broadcast %cst_27 : f32 to vector<1x3xf32>
    %44 = arith.mulf %43, %42 : vector<1x3xf32>
    %cst_28 = arith.constant -0.918938517 : f32
    %45 = vector.broadcast %cst_28 : f32 to vector<1x3xf32>
    %46 = arith.subf %45, %21 : vector<1x3xf32>
    %47 = vector.broadcast %38 : vector<1x3xf32> to vector<2x3xf32>
    %48 = arith.subf %47, %20 : vector<2x3xf32>
    %49 = arith.mulf %48, %48 : vector<2x3xf32>
    %cst_29 = arith.constant 0.000000e+00 : f32
    %50 = vector.broadcast %cst_29 : f32 to vector<2x3xf32>
    %51 = arith.subf %50, %49 : vector<2x3xf32>
    %52 = vector.broadcast %44 : vector<1x3xf32> to vector<2x3xf32>
    %53 = arith.mulf %51, %52 : vector<2x3xf32>
    %54 = vector.broadcast %46 : vector<1x3xf32> to vector<2x3xf32>
    %55 = arith.addf %53, %54 : vector<2x3xf32>
    %cst_30 = arith.constant dense<0.000000e+00> : vector<2xf32>
    %56 = vector.multi_reduction <add>, %55, %cst_30 [1] : vector<2x3xf32> to vector<2xf32>
    %57 = vector.shape_cast %56 : vector<2xf32> to vector<2x1xf32>
    %58 = tpu.iota {dimensions = array<i32: 1>} : vector<2x128xi32>
    %c4_i32 = arith.constant 4 : i32
    %59 = vector.broadcast %c4_i32 : i32 to vector<2x128xi32>
    %60 = arith.cmpi eq, %58, %59 : vector<2x128xi32>
    %cst_31 = arith.constant 0.000000e+00 : f32
    %61 = vector.shape_cast %57 : vector<2x1xf32> to vector<2x1xf32>
    %62 = vector.broadcast %61 : vector<2x1xf32> to vector<2x128xf32>
    %63 = vector.broadcast %cst_31 : f32 to vector<2x128xf32>
    %64 = arith.select %60, %62, %63 : vector<2x128xi1>, vector<2x128xf32>
    %65 = arith.addf %19, %64 : vector<2x128xf32>
    %c0_32 = arith.constant 0 : index
    %c0_33 = arith.constant 0 : index
    %66 = vector.load %arg9[%c0_32, %c0_33] : memref<2x128xf32, #tpu.memory_space<vmem>>, vector<2x128xf32>
    tpu.vector_store %arg9[%c0_32, %c0_33], %65 {strides = array<i32>} : memref<2x128xf32, #tpu.memory_space<vmem>>, vector<2x128xf32>,
    return
  }
}

</mosaic_0001>

<bundles_post_ra>
// kernel: tpu_custom_call.1
= control target key start
LH: loop header
LB: loop body
LE: loop exit
PB: predicated region body
PF: predicated region fallthrough
CT: control target
= control target key end

     0   :  { %16 = vsyncpa [#allocation3], 0  ;;  %s652_s0 = inlined_call_operand.hbm [shape: f32[2,16], index: 0, kind: input, shape index: {}]   ;;  %s653_s1 = inlined_call_operand.hbm [shape: f32[16,128], index: 1, kind: input, shape index: {}]   ;;  %s654_s2 = inlined_call_operand.vmem [shape: f32[1,128], index: 2, kind: input, shape index: {}]   ;;  %s655_s3 = inlined_call_operand.hbm [shape: f32[128,256], index: 3, kind: input, shape index: {}]   ;;  %s656_s4 = inlined_call_operand.vmem [shape: f32[1,256], index: 4, kind: input, shape index: {}]   ;;  %s657_s5 = inlined_call_operand.hbm [shape: f32[256,128], index: 5, kind: input, shape index: {}]   ;;  %s658_s6 = inlined_call_operand.vmem [shape: f32[1,128], index: 6, kind: input, shape index: {}]   ;;  %s659_s7 = inlined_call_operand.vmem [shape: f32[1,3], index: 7, kind: input, shape index: {}]   ;;  %s660_s8 = inlined_call_operand.vmem [shape: f32[1,3], index: 8, kind: input, shape index: {}]   ;;  %s661_s9 = inlined_call_operand.hbm [shape: f32[2,128], index: 9, kind: output, shape index: {0}]   ;;  %s662_s10 = inlined_call_operand.hbm [shape: f32[1,3], index: 10, kind: output, shape index: {1}]  }
   0x1   :  { %17 = vsyncpa [#allocation6], 0 }
   0x2   :  { %18 = vsyncpa [#allocation9], 0 }
   0x3   :  { %19 = vsyncpa [#allocation4], 0  ;;  %s36_s15 = sshll.u32 %s653_s1, 4  ;;  %s37_s15 = int_to_ptr.hbm [resolvable:$true] %s36_s15 }
   0x4   :  { %20 = vsyncpa [#allocation12], 0  ;;  %s554_s16 = smov [#allocation5]   ;;  %s26_s20 = sshll.u32 %s652_s0, 4  ;;  %s27_s20 = int_to_ptr.hbm [resolvable:$true] %s26_s20 }
   0x5   :  { %s38_s17 = sshll.u32 %s554_s16, 4  ;;  %s555_s21 = smov 128   ;;  %s39_s17 = int_to_ptr.vmem [resolvable:$true] %s38_s17 }
   0x6   :  { %s556_s22 = smov 8   ;;  %s557_s23 = smov [#allocation2]  }
   0x7   :  { %44 = dma.hbm_to_vmem [thread:$0]  %s37_s15, 256, %s39_s17, [#allocation6], %s555_s21, %s555_s21, %s556_s22  }
   0x8   :  { %s28_s24 = sshll.u32 %s557_s23, 4  ;;  %s51_s27 = sshll.u32 %s655_s3, 4  ;;  %s29_s24 = int_to_ptr.vmem [resolvable:$true] %s28_s24  ;;  %s52_s27 = int_to_ptr.hbm [resolvable:$true] %s51_s27 }
   0x9   :  { %31 = dma.hbm_to_vmem [thread:$0]  %s27_s20, 32, %s29_s24, [#allocation3]  }
   0xa   :  { %s558_s1 = smov [#allocation7]   ;;  %s66_s0 = sshll.u32 %s657_s5, 4  ;;  %s67_s0 = int_to_ptr.hbm [resolvable:$true] %s66_s0 }
   0xb   :  { %s53_s28 = sshll.u32 %s558_s1, 4  ;;  %s559_s11 = smov 256   ;;  %s54_s28 = int_to_ptr.vmem [resolvable:$true] %s53_s28 }
   0xc   :  { %s560_s12 = smov 16   ;;  %s561_s13 = smov [#allocation8]  }
   0xd   :  { %59 = dma.hbm_to_vmem [thread:$0]  %s52_s27, 4096, %s54_s28, [#allocation6], %s559_s11, %s559_s11, %s560_s12  }
   0xe   :  { %s68_s14 = sshll.u32 %s561_s13, 4  ;;  %s69_s14 = int_to_ptr.vmem [resolvable:$true] %s68_s14 }
   0xf   :  { %74 = dma.hbm_to_vmem [thread:$0]  %s67_s0, 4096, %s69_s14, [#allocation9], %s555_s21, %s555_s21, %s556_s22  }
  0x10   :  { %544 = dma.done.wait [#allocation3], 32  }
  0x11   :  { %545 = vsyncadd [#allocation3], 4294967264 }
  0x12   :  { %546 = dma.done.wait [#allocation6], 4352  }
  0x13   :  { %547 = vsyncadd [#allocation6], 4294962944 }
  0x14   :  { %548 = dma.done.wait [#allocation9], 4096  }
  0x15   :  { %549 = vsyncadd [#allocation9], 4294963200  ;;  %v99_v0 = vld [vmem:[#allocation5 + $0x8] sm:$0xff]  ;;  %v98_v1 = vld [vmem:[#allocation5] sm:$0xff]  ;;  %vm104_vm0 = vcmask 130048   ;;  %vm315_vm6 = vcmask 16384  }
  0x16   :  { %v97_v2 = vld [vmem:[#allocation2] sm:$0x3]  ;;  %122 = vmatpush.msra.mxu0 %v99_v0  ;;  %v159_v3 = vld [vmem:[#allocation7 + $0xf0] sm:$0xff]  ;;  %v160_v4 = vld [vmem:[#allocation7 + $0xf8] sm:$0xff]  ;;  %s360_s22 = sshll.u32 %s662_s10, 4  ;;  %vm334_vm7 = vcmask 17408   ;;  %s361_s22 = int_to_ptr.hbm [resolvable:$true] %s360_s22 }
  0x17   :  { %v157_v5 = vld [vmem:[#allocation7 + $0xe0] sm:$0xff]  ;;  %167 = vmatpush.msra.mxu1 %v159_v3  ;;  %187 = vmatpush.msra.mxu2 %v160_v4  ;;  %v158_v6 = vld [vmem:[#allocation7 + $0xe8] sm:$0xff]  ;;  %v155_v7 = vld [vmem:[#allocation7 + $0xd0] sm:$0xff]  ;;  %s563_s23 = smov [#allocation10]   ;;  %s349_s27 = sshll.u32 %s661_s9, 4  ;;  %s350_s27 = int_to_ptr.hbm [resolvable:$true] %s349_s27 }
  0x18   :  { %123 = vmatpush.msra.mxu0 %v98_v1  ;;  %v156_v8 = vld [vmem:[#allocation7 + $0xd8] sm:$0xff]  ;;  %v153_v9 = vld [vmem:[#allocation7 + $0xc0] sm:$0xff]  ;;  %v154_v10 = vld [vmem:[#allocation7 + $0xc8] sm:$0xff]  ;;  %s347_s24 = sshll.u32 %s563_s23, 4  ;;  %s348_s24 = int_to_ptr.vmem [resolvable:$true] %s347_s24 }
  0x19   :  { %377 = vmatmul.msk.f32.vlgmr.msra.gmra.mxu0 %vm104_vm0, %v97_v2  ;;  %168 = vmatpush.msra.mxu1 %v157_v5  ;;  %v151_v11 = vld [vmem:[#allocation7 + $0xb0] sm:$0xff]  ;;  %v152_v12 = vld [vmem:[#allocation7 + $0xb8] sm:$0xff]  ;;  %v149_v13 = vld [vmem:[#allocation7 + $0xa0] sm:$0xff] }
  0x1a   :  { %188 = vmatpush.msra.mxu2 %v158_v6  ;;  %v150_v14 = vld [vmem:[#allocation7 + $0xa8] sm:$0xff]  ;;  %v147_v15 = vld [vmem:[#allocation7 + $0x90] sm:$0xff]  ;;  %v148_v16 = vld [vmem:[#allocation7 + $0x98] sm:$0xff] }
  0x1b   :  { %169 = vmatpush.msra.mxu1 %v155_v7  ;;  %v145_v17 = vld [vmem:[#allocation7 + $0x80] sm:$0xff]  ;;  %v146_v18 = vld [vmem:[#allocation7 + $0x88] sm:$0xff]  ;;  %v143_v19 = vld [vmem:[#allocation7 + $0x70] sm:$0xff] }
  0x1c   :  { %189 = vmatpush.msra.mxu2 %v156_v8  ;;  %v144_v20 = vld [vmem:[#allocation7 + $0x78] sm:$0xff]  ;;  %v141_v21 = vld [vmem:[#allocation7 + $0x60] sm:$0xff]  ;;  %v142_v22 = vld [vmem:[#allocation7 + $0x68] sm:$0xff] }
  0x1d   :  { %170 = vmatpush.msra.mxu1 %v153_v9  ;;  %v139_v23 = vld [vmem:[#allocation7 + $0x50] sm:$0xff]  ;;  %v140_v24 = vld [vmem:[#allocation7 + $0x58] sm:$0xff]  ;;  %v137_v25 = vld [vmem:[#allocation7 + $0x40] sm:$0xff] }
  0x1e   :  { %190 = vmatpush.msra.mxu2 %v154_v10  ;;  %v138_v26 = vld [vmem:[#allocation7 + $0x48] sm:$0xff]  ;;  %v135_v27 = vld [vmem:[#allocation7 + $0x30] sm:$0xff]  ;;  %v136_v28 = vld [vmem:[#allocation7 + $0x38] sm:$0xff] }
  0x1f   :  { %171 = vmatpush.msra.mxu1 %v151_v11  ;;  %v133_v29 = vld [vmem:[#allocation7 + $0x20] sm:$0xff]  ;;  %v134_v30 = vld [vmem:[#allocation7 + $0x28] sm:$0xff]  ;;  %v131_v31 = vld [vmem:[#allocation7 + $0x10] sm:$0xff] }
  0x20   :  { %191 = vmatpush.msra.mxu2 %v152_v12  ;;  %v132_v32 = vld [vmem:[#allocation7 + $0x18] sm:$0xff]  ;;  %v129_v33 = vld [vmem:[#allocation7] sm:$0xff]  ;;  %v130_v34 = vld [vmem:[#allocation7 + $0x8] sm:$0xff] }
  0x21   :  { %172 = vmatpush.msra.mxu1 %v149_v13  ;;  %v224_v35 = vld [vmem:[#allocation8 + $0x78] sm:$0xff]  ;;  %v223_v36 = vld [vmem:[#allocation8 + $0x70] sm:$0xff]  ;;  %v222_v38 = vld [vmem:[#allocation8 + $0x68] sm:$0xff] }
  0x22   :  { %192 = vmatpush.msra.mxu2 %v150_v14  ;;  %245 = vmatpush.msra.mxu3 %v224_v35  ;;  %v240_v37 = vld [vmem:[#allocation8 + $0xf8] sm:$0xff]  ;;  %v239_v39 = vld [vmem:[#allocation8 + $0xf0] sm:$0xff]  ;;  %v238_v40 = vld [vmem:[#allocation8 + $0xe8] sm:$0xff] }
  0x23   :  { %173 = vmatpush.msra.mxu1 %v147_v15  ;;  %265 = vmatpush.msrb.mxu0 %v240_v37  ;;  %v221_v41 = vld [vmem:[#allocation8 + $0x60] sm:$0xff]  ;;  %v220_v43 = vld [vmem:[#allocation8 + $0x58] sm:$0xff]  ;;  %v219_v45 = vld [vmem:[#allocation8 + $0x50] sm:$0xff] }
  0x24   :  { %193 = vmatpush.msra.mxu2 %v148_v16  ;;  %246 = vmatpush.msra.mxu3 %v223_v36  ;;  %v237_v42 = vld [vmem:[#allocation8 + $0xe0] sm:$0xff]  ;;  %v236_v44 = vld [vmem:[#allocation8 + $0xd8] sm:$0xff]  ;;  %v235_v46 = vld [vmem:[#allocation8 + $0xd0] sm:$0xff] }
  0x25   :  { %174 = vmatpush.msra.mxu1 %v145_v17  ;;  %266 = vmatpush.msrb.mxu0 %v239_v39  ;;  %v218_v47 = vld [vmem:[#allocation8 + $0x48] sm:$0xff]  ;;  %v217_v49 = vld [vmem:[#allocation8 + $0x40] sm:$0xff]  ;;  %v216_v51 = vld [vmem:[#allocation8 + $0x38] sm:$0xff] }
  0x26   :  { %194 = vmatpush.msra.mxu2 %v146_v18  ;;  %247 = vmatpush.msra.mxu3 %v222_v38  ;;  %v234_v48 = vld [vmem:[#allocation8 + $0xc8] sm:$0xff]  ;;  %v233_v50 = vld [vmem:[#allocation8 + $0xc0] sm:$0xff]  ;;  %v232_v52 = vld [vmem:[#allocation8 + $0xb8] sm:$0xff] }
  0x27   :  { %175 = vmatpush.msra.mxu1 %v143_v19  ;;  %267 = vmatpush.msrb.mxu0 %v238_v40  ;;  %v215_v53 = vld [vmem:[#allocation8 + $0x30] sm:$0xff]  ;;  %v214_v55 = vld [vmem:[#allocation8 + $0x28] sm:$0xff]  ;;  %v213_v56 = vld [vmem:[#allocation8 + $0x20] sm:$0xff] }
  0x28   :  { %195 = vmatpush.msra.mxu2 %v144_v20  ;;  %248 = vmatpush.msra.mxu3 %v221_v41  ;;  %v231_v54 = vld [vmem:[#allocation8 + $0xb0] sm:$0xff]  ;;  %v212_v57 = vld [vmem:[#allocation8 + $0x18] sm:$0xff]  ;;  %v388_v58 = vld [vmem:[%s654_s2] ss:$0 sm:$0xff] }
  0x29   :  { %176 = vmatpush.msra.mxu1 %v141_v21  ;;  %268 = vmatpush.msrb.mxu0 %v237_v42  ;;  %v211_v62 = vld [vmem:[#allocation8 + $0x10] sm:$0xff]  ;;  %v230_v63 = vld [vmem:[#allocation8 + $0xa8] sm:$0xff]  ;;  %v229_v1 = vld [vmem:[#allocation8 + $0xa0] sm:$0xff] }
  0x2a   :  { %196 = vmatpush.msra.mxu2 %v142_v22  ;;  %249 = vmatpush.msra.mxu3 %v220_v43  ;;  %v210_v0 = vld [vmem:[#allocation8 + $0x8] sm:$0xff]  ;;  %v209_v2 = vld [vmem:[#allocation8] sm:$0xff]  ;;  %v228_v3 = vld [vmem:[#allocation8 + $0x98] sm:$0xff] }
  0x2b   :  { %177 = vmatpush.msra.mxu1 %v139_v23  ;;  %269 = vmatpush.msrb.mxu0 %v236_v44  ;;  %v227_v4 = vld [vmem:[#allocation8 + $0x90] sm:$0xff]  ;;  %v226_v5 = vld [vmem:[#allocation8 + $0x88] sm:$0xff]  ;;  %v225_v6 = vld [vmem:[#allocation8 + $0x80] sm:$0xff] }
  0x2c   :  { %197 = vmatpush.msra.mxu2 %v140_v24  ;;  %250 = vmatpush.msra.mxu3 %v219_v45  ;;  %v161_v7 = vld [vmem:[%s656_s4] sm:$0x3] }
  0x2d   :  { %178 = vmatpush.msra.mxu1 %v137_v25  ;;  %270 = vmatpush.msrb.mxu0 %v235_v46  ;;  %v163_v8 = vperm.slane %v161_v7, 0  ;;  %v164_v12 = vperm.slane %v161_v7, 1  ;;  %v285_v16 = vld [vmem:[%s659_s7] sm:$0x1] }
  0x2e   :  { %198 = vmatpush.msra.mxu2 %v138_v26  ;;  %251 = vmatpush.msra.mxu3 %v218_v47  ;;  %v286_v17 = vmul.f32 1.442695, %v285_v16  ;;  %v389_v18 = vld [vmem:[%s658_s6] ss:$0 sm:$0xff]  ;;  %s562_s6 = smov [#allocation11]  }
  0x2f   :  { %179 = vmatpush.msra.mxu1 %v135_v27  ;;  %271 = vmatpush.msrb.mxu0 %v234_v48  ;;  %v288_v20 = vld [vmem:[%s660_s8] sm:$0x1]  ;;  %s358_s7 = sshll.u32 %s562_s6, 4  ;;  %s359_s7 = int_to_ptr.vmem [resolvable:$true] %s358_s7 }
  0x30   :  { %199 = vmatpush.msra.mxu2 %v136_v28  ;;  %252 = vmatpush.msra.mxu3 %v217_v49  ;;  %390 = vpow2.f32 %v286_v17 }
  0x31   :  { %180 = vmatpush.msra.mxu1 %v133_v29  ;;  %272 = vmatpush.msrb.mxu0 %v233_v50 }
  0x32   :  { %200 = vmatpush.msra.mxu2 %v134_v30  ;;  %253 = vmatpush.msra.mxu3 %v216_v51  ;;  %v321_v51 = vsub.f32 -0.9189385, %v285_v16 }
  0x33   :  { %181 = vmatpush.msra.mxu1 %v131_v31  ;;  %273 = vmatpush.msrb.mxu0 %v232_v52  ;;  %v317_v31 = vmul.f32 -2.0, %v285_v16 }
  0x34   :  { %201 = vmatpush.msra.mxu2 %v132_v32  ;;  %254 = vmatpush.msra.mxu3 %v215_v53 }
  0x35   :  { %182 = vmatpush.msra.mxu1 %v129_v33  ;;  %274 = vmatpush.msrb.mxu0 %v231_v54  ;;  %v318_v32 = vmul.f32 1.442695, %v317_v31 }
  0x36   :  { %202 = vmatpush.msra.mxu2 %v130_v34  ;;  %255 = vmatpush.msra.mxu3 %v214_v55  ;;  %v391_v19 = vpop.eup %390  ;;  %v291_v34 = vlaneseq  ;;  %v331_v55 = vperm.slane %v321_v51, 0 }
  0x37   :  { %275 = vmatpush.msrb.mxu0 %v230_v63  ;;  %v289_v23 = vmul.f32 %v391_v19, %v288_v20 }
  0x38   :  { %256 = vmatpush.msra.mxu3 %v213_v56  ;;  %v292_v37 = vand.u32 127, %v291_v34 }
  0x39   :  { %276 = vmatpush.msrb.mxu0 %v229_v1 }
  0x3a   :  { %257 = vmatpush.msra.mxu3 %v212_v57  ;;  %vm293_vm3 = vcmp.eq.s32.totalorder %v292_v37, 0  ;;  %vm338_vm8 = vcmp.eq.s32.totalorder %v292_v37, 4 }
  0x3b   :  { %277 = vmatpush.msrb.mxu0 %v228_v3 }
  0x3c   :  { %258 = vmatpush.msra.mxu3 %v211_v62 }
  0x3d   :  { %278 = vmatpush.msrb.mxu0 %v227_v4 }
  0x3e   :  { %259 = vmatpush.msra.mxu3 %v210_v0 }
  0x3f   :  { %279 = vmatpush.msrb.mxu0 %v226_v5 }
  0x40   :  { %260 = vmatpush.msra.mxu3 %v209_v2 }
  0x41   :  { %280 = vmatpush.msrb.mxu0 %v225_v6 }
  0x96   :  { %v125_v59 = vpop.f32.mrf.mxu0 }
  0x97   :  { %v126_v60 = vadd.f32 %v388_v58, %v125_v59 }
  0x99   :  { %v128_v61 = vmax.f32 %v126_v60, 0.0 }
  0x9b   :  { %183 = vmatmul.f32.vlgmr.msra.gmra.mxu1 %v128_v61  ;;  %203 = vmatmul.f32.vlgmr.msra.gmra.mxu2 %v128_v61 }
 0x118   :  { %v184_v9 = vpop.f32.mrf.mxu1 }
 0x119   :  { %v185_v10 = vadd.f32 %v184_v9, %v163_v8 }
 0x11b   :  { %v207_v11 = vmax.f32 %v185_v10, 0.0 }
 0x11d   :  { %261 = vmatmul.f32.vlgmr.msra.gmra.mxu3 %v207_v11 }
 0x11e   :  { %v204_v13 = vpop.f32.mrf.mxu2 }
 0x11f   :  { %v205_v14 = vadd.f32 %v204_v13, %v164_v12 }
 0x121   :  { %v208_v15 = vmax.f32 %v205_v14, 0.0 }
 0x123   :  { %281 = vmatmul.f32.vlgmr.msrb.gmra.mxu0 %v208_v15 }
 0x1a0   :  { %v262_v21 = vpop.f32.mrf.mxu3  ;;  %v282_v24 = vpop.f32.mrf.mxu0 }
 0x1a1   :  { %v263_v22 = vadd.f32 %v389_v18, %v262_v21 }
 0x1a3   :  { %v283_v25 = vadd.f32 %v282_v24, %v263_v22 }
 0x1a5   :  { %v290_v26 = vadd.f32 %v289_v23, %v283_v25 }
 0x1a7   :  { %v295_v27 = vsub.f32 0.0, %v290_v26 }
 0x1a9   :  { %v296_v28 = vmul.f32 1.442695, %v295_v27 }
 0x1ab   :  { %392 = vpow2.f32 %v296_v28 }
 0x1b1   :  { %v393_v29 = vpop.eup %392 }
 0x1b2   :  { %v298_v30 = vadd.f32 1.0, %v393_v29 }
 0x1b4   :  { %394 = vrcp.f32 %v298_v30  ;;  %v310_v38 = vand.u32 2147483648, %v298_v30  ;;  %v308_v40 = vand.u32 2147483647, %v298_v30  ;;  %vm304_vm2 = vweird.f32 %v298_v30 }
 0x1b5   :  { %396 = vpow2.f32 %v318_v32 }
 0x1b6   :  { %398 = vtanh.f32 %v290_v26  ;;  %v311_v42 = vor.u32 1.1754944e-38, %v310_v38  ;;  %vm309_vm5 = vcmp.eq.f32.partialorder %v308_v40, 8.507059e+37 }
 0x1ba   :  { %v395_v33 = vpop.eup %394 }
 0x1bb   :  { %v300_v35 = vmul.f32 %v395_v33, %v298_v30  ;;  %vm305_vm1 = vweird.f32 %v395_v33  ;;  %v397_v43 = vpop.eup %396 }
 0x1bc   :  { %vm306_vm4 = vmor %vm304_vm2, %vm305_vm1  ;;  %v399_v45 = vpop.eup %398  ;;  %v320_v49 = vmul.f32 0.5, %v397_v43 }
 0x1bd   :  { %v301_v36 = vsub.f32 1.0, %v300_v35 }
 0x1be   :  { %v327_v53 = vperm.slane %v320_v49, 0 }
 0x1bf   :  { %v302_v39 = vmul.f32 %v395_v33, %v301_v36 }
 0x1c1   :  { %v303_v41 = vadd.f32 %v395_v33, %v302_v39 }
 0x1c3   :  { %v307_v44 = vsel %vm306_vm4, %v395_v33, %v303_v41 }
 0x1c4   :  { %v312_v46 = vsel %vm309_vm5, %v311_v42, %v307_v44 }
 0x1c5   :  { %v314_v47 = vsel %vm293_vm3, %v399_v45, %v312_v46 }
 0x1c6   :  { %v322_v48 = vperm.slane %v314_v47, 0  ;;  %316 = vst.msk [vmem:[#allocation11] sm:$0x1] %vm315_vm6, %v314_v47 }
 0x1c7   :  { %363 = dma.vmem_to_hbm [thread:$0]  %s359_s7, 16, %s361_s22, [#allocation12]  }
 0x1c8   :  { %v323_v50 = vsub.f32 %v322_v48, %v283_v25 }
 0x1ca   :  { %v324_v52 = vmul.f32 %v323_v50, %v323_v50 }
 0x1cc   :  { %v325_v54 = vsub.f32 0.0, %v324_v52 }
 0x1ce   :  { %v329_v56 = vmul.f32 %v327_v53, %v325_v54 }
 0x1d0   :  { %v333_v57 = vadd.f32 %v331_v55, %v329_v56 }
 0x1d2   :  { %v335_v58 = vsel %vm334_vm7, %v333_v57, 0.0 }
 0x1d3   :  { %336 = vadd.xlane.f32.xlu0 %v335_v58 }
 0x246   :  { %v337_v59 = vpop.xlane.xlu0 %336 }
 0x247   :  { %v339_v60 = vsel %vm338_vm8, %v337_v59, 0.0 }
 0x248   :  { %v340_v61 = vadd.f32 %v339_v60, %v283_v25 }
 0x24a   :  { %341 = vst [vmem:[#allocation10] sm:$0x3] %v340_v61 }
 0x24b   :  { %352 = dma.vmem_to_hbm [thread:$0]  %s348_s24, 32, %s350_s27, [#allocation4]  }
 0x24c   :  { %550 = dma.done.wait [#allocation4], 32  }
 0x24d   :  { %551 = vsyncadd [#allocation4], 4294967264 }
 0x24e   :  { %552 = dma.done.wait [#allocation12], 16  }
 0x24f   :  { %553 = vsyncadd [#allocation12], 4294967280 }
 0x250   :  { %372 = vsyncpa [#allocation3], 1 }
 0x251   :  { %373 = vsyncpa [#allocation6], 1 }
 0x252   :  { %374 = vsyncpa [#allocation9], 1 }
 0x253   :  { %375 = vsyncpa [#allocation4], 1 }
 0x254   :  { %376 = vsyncpa [#allocation12], 1 }

</bundles_post_ra>
